<compile_context>
chip_gen: v6e
topology: v6e:2x2x1
jax: 0.10.0
libtpu: 0.0.40
codegen_flags: <defaults>
</compile_context>

<pallas_src>
import functools

import jax
import jax.numpy as jnp
from jax.experimental import pallas as pl
from jax.experimental.pallas import tpu as pltpu


def _round_up(x, m):
    return ((x + m - 1) // m) * m


def _auto_block_rows(n_rows, n_cols, itemsize,
                     target_bytes=2 * 1024 * 1024, max_rows=4096):
    """Pick a batch tile: large enough to amortize per-grid-step overhead,
    small enough to double-buffer comfortably inside the scoped VMEM limit on
    v5e / v6e / v7x (v7x only has 64 MiB physical VMEM)."""
    # Sublane granule: 8 rows for 4-byte dtypes, 16 for bf16, 32 for int8/fp8.
    granule = 8 * max(1, 4 // max(1, itemsize))
    rows = target_bytes // max(1, n_cols * itemsize)
    rows = max(granule, min(int(rows), max_rows))
    rows = (rows // granule) * granule
    if rows >= n_rows:
        return n_rows          # whole batch fits one block (full-dim block is always legal)
    return rows


def _mdca_lsl_kernel(logits_ref, target_ref, nll_ref, conf_ref, cnt_ref, *,
                     smoothing, n_rows, block_rows, tiles_per_split, need_mask):
    s = pl.program_id(0)          # batch split (parallel across cores on v7x)
    i = pl.program_id(1)          # tile within this split (reduction axis)

    # Zero the per-split accumulators (the outputs themselves) at the first tile.
    @pl.when(i == 0)
    def _init():
        nll_ref[...] = jnp.zeros_like(nll_ref)
        conf_ref[...] = jnp.zeros_like(conf_ref)
        cnt_ref[...] = jnp.zeros_like(cnt_ref)

    x = logits_ref[...].astype(jnp.float32)             # [TB, C] (cast after landing in VMEM)
    t = target_ref[...]                                  # [TB, 1] int32
    tb, c = x.shape

    # softmax / log-softmax pieces along the class (lane) axis.
    m = jnp.max(x, axis=-1, keepdims=True)               # [TB, 1]
    z = x - m
    ez = jnp.exp(z)
    denom = jnp.sum(ez, axis=-1, keepdims=True)           # [TB, 1]
    p = ez / denom                                        # softmax, [TB, C]
    log_denom = jnp.log(denom)                            # [TB, 1]

    # one-hot(target) via iota compare (the scatter_ in the torch code).
    cls_idx = jax.lax.broadcasted_iota(jnp.int32, (tb, c), 1)
    onehot = (cls_idx == t).astype(jnp.float32)           # [TB, C]

    confidence = 1.0 - smoothing
    smooth_val = smoothing / (c - 1)

    # -sum_c true_dist * logp without materializing true_dist:
    #   = -( smooth_val * sum_c logp + (confidence - smooth_val) * logp[target] )
    sum_logp = jnp.sum(z, axis=-1, keepdims=True) - c * log_denom          # [TB, 1]
    tgt_logp = jnp.sum(onehot * z, axis=-1, keepdims=True) - log_denom     # [TB, 1]
    per_row = -(smooth_val * sum_logp + (confidence - smooth_val) * tgt_logp)

    if need_mask:
        # Rows past the true batch (ragged last tile / over-provisioned split tile)
        # must not contribute. Use selects so garbage / NaN never leaks into sums.
        row0 = (s * tiles_per_split + i) * block_rows
        rows = row0 + jax.lax.broadcasted_iota(jnp.int32, (tb, 1), 0)
        valid = rows < n_rows                              # [TB, 1] bool
        per_row = jnp.where(valid, per_row, 0.0)
        p = jnp.where(valid, p, 0.0)
        onehot = jnp.where(valid, onehot, 0.0)

    nll_ref[...] += jnp.sum(per_row, axis=0, keepdims=True).reshape(1, 1, 1)
    conf_ref[...] += jnp.sum(p, axis=0, keepdims=True).reshape(1, 1, c)
    cnt_ref[...] += jnp.sum(onehot, axis=0, keepdims=True).reshape(1, 1, c)


def mdca_labelsmooth_loss(logits, target, *, n_classes, alpha=0.0, beta=0.0,
                          block_rows=None, num_splits=2):
    """logits: [B, n_classes] (any float dtype), target: [B] int.
    Returns (dict(loss=.), loss_cal, loss_nll) as f32 scalars."""
    B, C = logits.shape
    assert C == n_classes
    t2 = target.reshape(B, 1).astype(jnp.int32)

    if block_rows is None:
        block_rows = _auto_block_rows(B, C, jnp.dtype(logits.dtype).itemsize)
    tb = int(block_rows)
    tiles_total = (B + tb - 1) // tb
    nsplit = max(1, min(int(num_splits), tiles_total))
    tps = (tiles_total + nsplit - 1) // nsplit          # tiles handled per split
    need_mask = (nsplit * tps * tb) != B

    def in_map(split, tile):
        gt = split * tps + tile                          # global tile index
        gt = jnp.minimum(gt, tiles_total - 1)            # clamp over-provisioned tiles
        return (gt, 0)

    kernel = functools.partial(
        _mdca_lsl_kernel, smoothing=float(alpha), n_rows=B, block_rows=tb,
        tiles_per_split=tps, need_mask=bool(need_mask))

    out_shape = (
        jax.ShapeDtypeStruct((nsplit, 1, 1), jnp.float32),   # sum of per-row NLL
        jax.ShapeDtypeStruct((nsplit, 1, C), jnp.float32),   # sum_b softmax
        jax.ShapeDtypeStruct((nsplit, 1, C), jnp.float32),   # target histogram (sum of one-hots)
    )
    nll_parts, conf_parts, cnt_parts = pl.pallas_call(
        kernel,
        out_shape=out_shape,
        grid=(nsplit, tps),
        in_specs=[
            pl.BlockSpec((tb, C), in_map),                # logits tile, native dtype
            pl.BlockSpec((tb, 1), in_map),                # target tile
        ],
        out_specs=(
            pl.BlockSpec((1, 1, 1), lambda s, i: (s, 0, 0)),
            pl.BlockSpec((1, 1, C), lambda s, i: (s, 0, 0)),
            pl.BlockSpec((1, 1, C), lambda s, i: (s, 0, 0)),
        ),
        compiler_params=pltpu.CompilerParams(
            dimension_semantics=("parallel", "arbitrary"),
            vmem_limit_bytes=32 * 1024 * 1024,
        ),
    )(logits, t2)

    # Tiny final combine (a few [nsplit, C] ops) in plain JAX.
    inv_b = jnp.float32(1.0 / B)
    loss_nll = jnp.sum(nll_parts) * inv_b
    diff = jnp.sum(conf_parts - cnt_parts, axis=0)           # per-class batch-sum difference
    loss_cal = jnp.sum(jnp.abs(diff)) * inv_b / C
    loss = loss_nll + jnp.float32(beta) * loss_cal
    return dict(loss=loss), loss_cal, loss_nll


def _reference(logits, target, *, n_classes, alpha, beta):
    """Pure-JAX reference matching the PyTorch forward."""
    logits = logits.astype(jnp.float32)
    logp = jax.nn.log_softmax(logits, axis=-1)
    p = jax.nn.softmax(logits, axis=-1)
    onehot = jax.nn.one_hot(target, n_classes, dtype=jnp.float32)
    smooth_val = alpha / (n_classes - 1)
    true_dist = smooth_val + onehot * ((1.0 - alpha) - smooth_val)
    loss_nll = jnp.mean(jnp.sum(-true_dist * logp, axis=-1))
    loss_cal = jnp.sum(jnp.abs(jnp.mean(p, axis=0) - jnp.mean(onehot, axis=0))) / n_classes
    return loss_nll + beta * loss_cal, loss_cal, loss_nll


if __name__ == "__main__":
    key = jax.random.PRNGKey(0)
    k1, k2, k3, k4 = jax.random.split(key, 4)

    # Case 1: multi-tile grid, 2-way batch split, ragged last tile (50 % 8 != 0).
    B1, C1, alpha1, beta1 = 50, 16, 0.1, 1.0
    logits1 = jax.random.normal(k1, (B1, C1), dtype=jnp.float32)
    target1 = jax.random.randint(k2, (B1,), 0, C1, dtype=jnp.int32)
    out1, cal1, nll1 = mdca_labelsmooth_loss(
        logits1, target1, n_classes=C1, alpha=alpha1, beta=beta1,
        block_rows=8, num_splits=2)
    jax.block_until_ready((out1["loss"], cal1, nll1))
    r_loss1, r_cal1, r_nll1 = _reference(
        logits1, target1, n_classes=C1, alpha=alpha1, beta=beta1)
    assert jnp.allclose(out1["loss"], r_loss1, atol=1e-5, rtol=1e-5)
    assert jnp.allclose(cal1, r_cal1, atol=1e-5, rtol=1e-5)
    assert jnp.allclose(nll1, r_nll1, atol=1e-5, rtol=1e-5)

    # Case 2: single-tile path, alpha=0 (plain CE term), bf16 logits kept in
    # native dtype in HBM and cast to f32 only inside the kernel.
    B2, C2, alpha2, beta2 = 8, 16, 0.0, 0.5
    logits2 = jax.random.normal(k3, (B2, C2), dtype=jnp.float32).astype(jnp.bfloat16)
    target2 = jax.random.randint(k4, (B2,), 0, C2, dtype=jnp.int32)
    out2, cal2, nll2 = mdca_labelsmooth_loss(
        logits2, target2, n_classes=C2, alpha=alpha2, beta=beta2)
    jax.block_until_ready((out2["loss"], cal2, nll2))
    r_loss2, r_cal2, r_nll2 = _reference(
        logits2, target2, n_classes=C2, alpha=alpha2, beta=beta2)
    assert jnp.allclose(out2["loss"], r_loss2, atol=1e-5, rtol=1e-5)
    assert jnp.allclose(cal2, r_cal2, atol=1e-5, rtol=1e-5)
    assert jnp.allclose(nll2, r_nll2, atol=1e-5, rtol=1e-5)

    print("KERNEL_OK")
</pallas_src>

<mosaic_0001>
module attributes {stable_mosaic.version = 11 : i64} {
  func.func @_mdca_lsl_kernel(%arg0: i32, %arg1: i32, %arg2: memref<8x16xf32, #tpu.memory_space<vmem>>, %arg3: memref<8x1xi32, #tpu.memory_space<vmem>>, %arg4: memref<1x1x1xf32, #tpu.memory_space<vmem>>, %arg5: memref<1x1x16xf32, #tpu.memory_space<vmem>>, %arg6: memref<1x1x16xf32, #tpu.memory_space<vmem>>) attributes {dimension_semantics = [#tpu.dimension_semantics<parallel>, #tpu.dimension_semantics<arbitrary>], iteration_bounds = array<i64: 2, 4>, scalar_prefetch = 0 : i64, scratch_operands = 0 : i64, tpu.core_type = #tpu.core_type<tc>, window_params = [{transform_indices = @transform_0, window_bounds = array<i64: 8, 16>}, {transform_indices = @transform_1, window_bounds = array<i64: 8, 1>}, {transform_indices = @transform_2, window_bounds = array<i64: 1, 1, 1>}, {transform_indices = @transform_3, window_bounds = array<i64: 1, 1, 16>}, {transform_indices = @transform_4, window_bounds = array<i64: 1, 1, 16>}]} {
    %c0_i32 = arith.constant 0 : i32
    %0 = arith.cmpi eq, %arg1, %c0_i32 : i32
    %1 = arith.extui %0 : i1 to i32
    %c0_i32_0 = arith.constant 0 : i32
    %2 = arith.cmpi ne, %1, %c0_i32_0 : i32
    scf.if %2 {
      %cst_35 = arith.constant 0.000000e+00 : f32
      %72 = vector.broadcast %cst_35 : f32 to vector<1x1x1xf32>
      %c0_36 = arith.constant 0 : index
      %c0_37 = arith.constant 0 : index
      %c0_38 = arith.constant 0 : index
      %73 = vector.load %arg4[%c0_36, %c0_37, %c0_38] : memref<1x1x1xf32, #tpu.memory_space<vmem>>, vector<1x1x1xf32>
      tpu.vector_store %arg4[%c0_36, %c0_37, %c0_38], %72 {strides = array<i32>} : memref<1x1x1xf32, #tpu.memory_space<vmem>>, vector<1x1x1xf32>,
      %cst_39 = arith.constant 0.000000e+00 : f32
      %74 = vector.broadcast %cst_39 : f32 to vector<1x1x16xf32>
      %c0_40 = arith.constant 0 : index
      %c0_41 = arith.constant 0 : index
      %c0_42 = arith.constant 0 : index
      %75 = vector.load %arg5[%c0_40, %c0_41, %c0_42] : memref<1x1x16xf32, #tpu.memory_space<vmem>>, vector<1x1x16xf32>
      tpu.vector_store %arg5[%c0_40, %c0_41, %c0_42], %74 {strides = array<i32>} : memref<1x1x16xf32, #tpu.memory_space<vmem>>, vector<1x1x16xf32>,
      %cst_43 = arith.constant 0.000000e+00 : f32
      %76 = vector.broadcast %cst_43 : f32 to vector<1x1x16xf32>
      %c0_44 = arith.constant 0 : index
      %c0_45 = arith.constant 0 : index
      %c0_46 = arith.constant 0 : index
      %77 = vector.load %arg6[%c0_44, %c0_45, %c0_46] : memref<1x1x16xf32, #tpu.memory_space<vmem>>, vector<1x1x16xf32>
      tpu.vector_store %arg6[%c0_44, %c0_45, %c0_46], %76 {strides = array<i32>} : memref<1x1x16xf32, #tpu.memory_space<vmem>>, vector<1x1x16xf32>,
    } else {
    }
    %c0 = arith.constant 0 : index
    %c0_1 = arith.constant 0 : index
    %3 = vector.load %arg2[%c0, %c0_1] : memref<8x16xf32, #tpu.memory_space<vmem>>, vector<8x16xf32>
    %c0_2 = arith.constant 0 : index
    %c0_3 = arith.constant 0 : index
    %4 = vector.load %arg3[%c0_2, %c0_3] : memref<8x1xi32, #tpu.memory_space<vmem>>, vector<8x1xi32>
    %cst = arith.constant dense<0xFF800000> : vector<8xf32>
    %5 = vector.multi_reduction <maximumf>, %3, %cst [1] : vector<8x16xf32> to vector<8xf32>
    %6 = vector.shape_cast %5 : vector<8xf32> to vector<8x1xf32>
    %7 = vector.broadcast %6 : vector<8x1xf32> to vector<8x16xf32>
    %8 = arith.subf %3, %7 : vector<8x16xf32>
    %9 = math.exp %8 : vector<8x16xf32>
    %cst_4 = arith.constant dense<0.000000e+00> : vector<8xf32>
    %10 = vector.multi_reduction <add>, %9, %cst_4 [1] : vector<8x16xf32> to vector<8xf32>
    %11 = vector.shape_cast %10 : vector<8xf32> to vector<8x1xf32>
    %12 = vector.broadcast %11 : vector<8x1xf32> to vector<8x16xf32>
    %13 = arith.divf %9, %12 : vector<8x16xf32>
    %14 = math.log %11 : vector<8x1xf32>
    %15 = tpu.iota {dimensions = array<i32: 1>} : vector<8x16xi32>
    %16 = vector.broadcast %4 : vector<8x1xi32> to vector<8x16xi32>
    %17 = arith.cmpi eq, %15, %16 : vector<8x16xi32>
    %18 = arith.extui %17 : vector<8x16xi1> to vector<8x16xi32>
    %19 = arith.sitofp %18 : vector<8x16xi32> to vector<8x16xf32>
    %cst_5 = arith.constant dense<0.000000e+00> : vector<8xf32>
    %20 = vector.multi_reduction <add>, %8, %cst_5 [1] : vector<8x16xf32> to vector<8xf32>
    %21 = vector.shape_cast %20 : vector<8xf32> to vector<8x1xf32>
    %cst_6 = arith.constant 1.600000e+01 : f32
    %22 = vector.broadcast %cst_6 : f32 to vector<8x1xf32>
    %23 = arith.mulf %22, %14 : vector<8x1xf32>
    %24 = arith.subf %21, %23 : vector<8x1xf32>
    %25 = arith.mulf %19, %8 : vector<8x16xf32>
    %cst_7 = arith.constant dense<0.000000e+00> : vector<8xf32>
    %26 = vector.multi_reduction <add>, %25, %cst_7 [1] : vector<8x16xf32> to vector<8xf32>
    %27 = vector.shape_cast %26 : vector<8xf32> to vector<8x1xf32>
    %28 = arith.subf %27, %14 : vector<8x1xf32>
    %cst_8 = arith.constant 0.00666666683 : f32
    %29 = vector.broadcast %cst_8 : f32 to vector<8x1xf32>
    %30 = arith.mulf %29, %24 : vector<8x1xf32>
    %cst_9 = arith.constant 0.893333315 : f32
    %31 = vector.broadcast %cst_9 : f32 to vector<8x1xf32>
    %32 = arith.mulf %31, %28 : vector<8x1xf32>
    %33 = arith.addf %30, %32 : vector<8x1xf32>
    %cst_10 = arith.constant 0.000000e+00 : f32
    %34 = vector.broadcast %cst_10 : f32 to vector<8x1xf32>
    %35 = arith.subf %34, %33 : vector<8x1xf32>
    %c4_i32 = arith.constant 4 : i32
    %36 = arith.muli %arg0, %c4_i32 : i32
    %37 = arith.addi %36, %arg1 : i32
    %c8_i32 = arith.constant 8 : i32
    %38 = arith.muli %37, %c8_i32 : i32
    %39 = tpu.iota {dimensions = array<i32: 0>} : vector<8x1xi32>
    %40 = vector.broadcast %38 : i32 to vector<8x1xi32>
    %41 = arith.addi %40, %39 : vector<8x1xi32>
    %c50_i32 = arith.constant 50 : i32
    %42 = vector.broadcast %c50_i32 : i32 to vector<8x1xi32>
    %43 = arith.cmpi slt, %41, %42 : vector<8x1xi32>
    %cst_11 = arith.constant 0.000000e+00 : f32
    %44 = vector.broadcast %cst_11 : f32 to vector<8x1xf32>
    %45 = arith.select %43, %35, %44 : vector<8x1xi1>, vector<8x1xf32>
    %cst_12 = arith.constant 0.000000e+00 : f32
    %46 = vector.shape_cast %43 : vector<8x1xi1> to vector<8x1xi1>
    %47 = vector.broadcast %46 : vector<8x1xi1> to vector<8x16xi1>
    %48 = vector.broadcast %cst_12 : f32 to vector<8x16xf32>
    %49 = arith.select %47, %13, %48 : vector<8x16xi1>, vector<8x16xf32>
    %cst_13 = arith.constant 0.000000e+00 : f32
    %50 = vector.shape_cast %43 : vector<8x1xi1> to vector<8x1xi1>
    %51 = vector.broadcast %50 : vector<8x1xi1> to vector<8x16xi1>
    %52 = vector.broadcast %cst_13 : f32 to vector<8x16xf32>
    %53 = arith.select %51, %19, %52 : vector<8x16xi1>, vector<8x16xf32>
    %c0_14 = arith.constant 0 : index
    %c0_15 = arith.constant 0 : index
    %c0_16 = arith.constant 0 : index
    %54 = vector.load %arg4[%c0_14, %c0_15, %c0_16] : memref<1x1x1xf32, #tpu.memory_space<vmem>>, vector<1x1x1xf32>
    %cst_17 = arith.constant dense<0.000000e+00> : vector<1xf32>
    %55 = vector.multi_reduction <add>, %45, %cst_17 [0] : vector<8x1xf32> to vector<1xf32>
    %56 = vector.shape_cast %55 : vector<1xf32> to vector<1x1xf32>
    %57 = vector.shape_cast %56 : vector<1x1xf32> to vector<1x1x1xf32>
    %58 = arith.addf %54, %57 : vector<1x1x1xf32>
    %c0_18 = arith.constant 0 : index
    %c0_19 = arith.constant 0 : index
    %c0_20 = arith.constant 0 : index
    %59 = vector.load %arg4[%c0_18, %c0_19, %c0_20] : memref<1x1x1xf32, #tpu.memory_space<vmem>>, vector<1x1x1xf32>
    tpu.vector_store %arg4[%c0_18, %c0_19, %c0_20], %58 {strides = array<i32>} : memref<1x1x1xf32, #tpu.memory_space<vmem>>, vector<1x1x1xf32>,
    %c0_21 = arith.constant 0 : index
    %c0_22 = arith.constant 0 : index
    %c0_23 = arith.constant 0 : index
    %60 = vector.load %arg5[%c0_21, %c0_22, %c0_23] : memref<1x1x16xf32, #tpu.memory_space<vmem>>, vector<1x1x16xf32>
    %cst_24 = arith.constant dense<0.000000e+00> : vector<16xf32>
    %61 = vector.multi_reduction <add>, %49, %cst_24 [0] : vector<8x16xf32> to vector<16xf32>
    %62 = vector.shape_cast %61 : vector<16xf32> to vector<1x16xf32>
    %63 = vector.shape_cast %62 : vector<1x16xf32> to vector<1x1x16xf32>
    %64 = arith.addf %60, %63 : vector<1x1x16xf32>
    %c0_25 = arith.constant 0 : index
    %c0_26 = arith.constant 0 : index
    %c0_27 = arith.constant 0 : index
    %65 = vector.load %arg5[%c0_25, %c0_26, %c0_27] : memref<1x1x16xf32, #tpu.memory_space<vmem>>, vector<1x1x16xf32>
    tpu.vector_store %arg5[%c0_25, %c0_26, %c0_27], %64 {strides = array<i32>} : memref<1x1x16xf32, #tpu.memory_space<vmem>>, vector<1x1x16xf32>,
    %c0_28 = arith.constant 0 : index
    %c0_29 = arith.constant 0 : index
    %c0_30 = arith.constant 0 : index
    %66 = vector.load %arg6[%c0_28, %c0_29, %c0_30] : memref<1x1x16xf32, #tpu.memory_space<vmem>>, vector<1x1x16xf32>
    %cst_31 = arith.constant dense<0.000000e+00> : vector<16xf32>
    %67 = vector.multi_reduction <add>, %53, %cst_31 [0] : vector<8x16xf32> to vector<16xf32>
    %68 = vector.shape_cast %67 : vector<16xf32> to vector<1x16xf32>
    %69 = vector.shape_cast %68 : vector<1x16xf32> to vector<1x1x16xf32>
    %70 = arith.addf %66, %69 : vector<1x1x16xf32>
    %c0_32 = arith.constant 0 : index
    %c0_33 = arith.constant 0 : index
    %c0_34 = arith.constant 0 : index
    %71 = vector.load %arg6[%c0_32, %c0_33, %c0_34] : memref<1x1x16xf32, #tpu.memory_space<vmem>>, vector<1x1x16xf32>
    tpu.vector_store %arg6[%c0_32, %c0_33, %c0_34], %70 {strides = array<i32>} : memref<1x1x16xf32, #tpu.memory_space<vmem>>, vector<1x1x16xf32>,
    return
  }
  func.func @transform_0(%arg0: i32, %arg1: i32) -> (i32, i32) {
    %c4_i32 = arith.constant 4 : i32
    %0 = arith.muli %arg0, %c4_i32 : i32
    %1 = arith.addi %0, %arg1 : i32
    %c6_i32 = arith.constant 6 : i32
    %2 = arith.minsi %1, %c6_i32 : i32
    %c0_i32 = arith.constant 0 : i32
    %c0_i32_0 = arith.constant 0 : i32
    return %2, %c0_i32 : i32, i32
  }
  func.func @transform_1(%arg0: i32, %arg1: i32) -> (i32, i32) {
    %c4_i32 = arith.constant 4 : i32
    %0 = arith.muli %arg0, %c4_i32 : i32
    %1 = arith.addi %0, %arg1 : i32
    %c6_i32 = arith.constant 6 : i32
    %2 = arith.minsi %1, %c6_i32 : i32
    %c0_i32 = arith.constant 0 : i32
    %c0_i32_0 = arith.constant 0 : i32
    return %2, %c0_i32 : i32, i32
  }
  func.func @transform_2(%arg0: i32, %arg1: i32) -> (i32, i32, i32) {
    %c0_i32 = arith.constant 0 : i32
    %c0_i32_0 = arith.constant 0 : i32
    %c0_i32_1 = arith.constant 0 : i32
    return %arg0, %c0_i32, %c0_i32_0 : i32, i32, i32
  }
  func.func @transform_3(%arg0: i32, %arg1: i32) -> (i32, i32, i32) {
    %c0_i32 = arith.constant 0 : i32
    %c0_i32_0 = arith.constant 0 : i32
    %c0_i32_1 = arith.constant 0 : i32
    return %arg0, %c0_i32, %c0_i32_0 : i32, i32, i32
  }
  func.func @transform_4(%arg0: i32, %arg1: i32) -> (i32, i32, i32) {
    %c0_i32 = arith.constant 0 : i32
    %c0_i32_0 = arith.constant 0 : i32
    %c0_i32_1 = arith.constant 0 : i32
    return %arg0, %c0_i32, %c0_i32_0 : i32, i32, i32
  }
}

</mosaic_0001>

<bundles_post_ra>
// kernel: tpu_custom_call.1
= control target key start
LH: loop header
LB: loop body
LE: loop exit
PB: predicated region body
PF: predicated region fallthrough
CT: control target
= control target key end

     0   :  { %10 = vsyncpa [#allocation3], 0  ;;  %s1012_s0 = inlined_call_operand.vmem [shape: f32[50,16], index: 0, kind: input, shape index: {}]   ;;  %s1013_s1 = inlined_call_operand.vmem [shape: s32[50,1], index: 1, kind: input, shape index: {}]   ;;  %s1014_s2 = inlined_call_operand.vmem [shape: f32[2,1,1], index: 2, kind: output, shape index: {0}]   ;;  %s1015_s3 = inlined_call_operand.hbm [shape: f32[2,1,16], index: 3, kind: output, shape index: {1}]   ;;  %s1016_s4 = inlined_call_operand.hbm [shape: f32[2,1,16], index: 4, kind: output, shape index: {2}]  }
   0x1   :  { %12 = vsyncpa [#allocation3 + $0x1], 0 }
   0x2   :  { %13 = vsyncpa [#allocation5], 0 }
   0x3   :  { %15 = vsyncpa [#allocation5 + $0x1], 0  ;;  %s814_s15 = smov 0   ;;  %s816_s16 = smov 0  }
   0x4   :  { %s818_s17 = smov 0   ;;  %s820_s18 = smov 0  }
   0x5   :  { %s822_s19 = smov 0   ;;  %s824_s20 = smov 0  }
   0x6   :  { %s826_s21 = smov 0   ;;  %s828_s22 = smov 0  }
   0x7 LB: > { %1019 = sst [smem:[#allocation8_spill]] %s778_s21  ;;  %s547_s23 = sadd.s32 4294967295, %s782_s22   ;;  %s782_s22 = sphi %s828_s22, %s21_s22   ;;  %s778_s21 = sphi %s826_s21, %s1026_s21   ;;  %s774_s20 = sphi %s824_s20, %s1031_s20   ;;  %s770_s19 = sphi %s822_s19, %s1024_s19   ;;  %s766_s18 = sphi %s820_s18, %s1030_s18   ;;  %s762_s17 = sphi %s818_s17, %s1029_s17   ;;  %s758_s16 = sphi %s816_s16, %s1028_s16   ;;  %s754_s15 = sphi %s814_s15, %s1027_s15  }
   0x8   : > { %s548_s24 = sadd.s32 4294967294, %s782_s22   ;;  %s30_s25 = sadd.s32 1, %s774_s20 }
   0x9   : > { %p31_p0 = scmp.ge.s32.totalorder %s30_s25, 4  ;;  %s33_s26 = sadd.s32 1, %s778_s21 }
   0xa   : > { %p144_p1 = scmp.ne.s32.totalorder %s762_s17, %s758_s16  ;;  %p145_p2 = scmp.eq.s32.totalorder %s547_s23, 7 }
   0xb   : > { %s1033_s25 = smov (%p31_p0, %s30_s25), 0  ;;  %s1035_s26 = smov (!%p31_p0, %s33_s26), %s778_s21 }
   0xc   : > { %1020 = sst [smem:[#allocation9_spill]] %s1033_s25  ;;  %p863_p3 = por %p145_p2, %p144_p1 }
   0xd   : > { %p150_p4 = scmp.ne.s32.totalorder %s758_s16, %s754_s15  ;;  %p35_p5 = scmp.ge.s32.totalorder %s1035_s26, 2 }
   0xe   : > { %p151_p6 = scmp.eq.s32.totalorder %s548_s24, 7  ;;  %p555_p7 = scmp.ge.s32.totalorder %s782_s22, 1 }
   0xf   : > { %p225_p8 = scmp.lt.s32.totalorder %s782_s22, 9  ;;  %s1037_s26 = smov (%p35_p5, %s1035_s26), 0 }
  0x10   : > { %1022 = sst [smem:[#allocation10_spill]] %s1037_s26  ;;  %p873_p9 = por %p151_p6, %p150_p4 }
  0x11   : > { %p226_p10 = pnand %p555_p7, %p225_p8  ;;  %s131_s29 = ssub.s32 %s778_s21, %s1037_s26 }
  0x12   : > { %s134_s30 = sadd.s32 1, %s762_s17  ;;  %p132_p11 = scmp.eq.s32.totalorder %s131_s29, 0 }
  0x13   : > { %229 = sbr.rel (%p226_p10) target bundleno = 386 (0x182), region = 28  ;;  %s884_s6 = sand.u32 (!%p226_p10), 1, %s758_s16  }
  0x14   : > { %s881_s5 = scalar_select %p132_p11, %s762_s17, %s134_s30  }
  0x15   : > { %s556_s7 = sshll.u32 (!%p226_p10), %s770_s19, 2  ;;  %p292_p12 = scmp.lt.s32.totalorder (!%p226_p10), %s770_s19, 1 }
  0x16   : > { %s888_s8 = sadd.s32 (!%p226_p10), %s766_s18, %s556_s7  ;;  %s906_s25 = scalar_lea.vmem (!%p226_p10), [#allocation2], %s884_s6 }
  0x17   : > { %p270_p13 = scmp.lt.s32.totalorder (!%p226_p10), %s888_s8, 6  ;;  %s909_s21 = scalar_lea.vmem (!%p226_p10), [#allocation4], %s884_s6 }
  0x18   : > { %s293_s9 = scalar_select %p292_p12, %s770_s19, 1 }
  0x19   : > { %s271_s10 = scalar_select %p270_p13, %s888_s8, 6 }
  0x1a   : > { %s897_s13 = scalar_lea.vmem %s1014_s2, %s293_s9  ;;  %p566_p0 = scmp.ne.s32.totalorder %s766_s18, 0 }
  0x1b   : > { %s1039_s10 = smov (!%p270_p13, %s271_s10), 6 }
  0x1c   : > { %s560_s14 = sshll.u32 %s1039_s10, 3  ;;  %298 = sbr.rel (%p566_p0) target bundleno = 36 (0x24), region = 32 }
  0x1d   : > { %s275_s29 = scalar_lea.vmem %s1012_s0, %s560_s14  ;;  %s287_s26 = scalar_lea.vmem %s1013_s1, %s560_s14 }
  0x21   : > { %vm299_vm0 = vcmask 0   ;;  %vm301_vm1 = vcmask 122880   ;;  %v784_v0 = vmov 0.0  }
  0x22   : > { %300 = vst.msk [vmem:[%s897_s13] sm:$0x1] %vm299_vm0, %v784_v0 }
  0x23   : > { %302 = vst.msk [vmem:[%s906_s25] sm:$0x1] %vm301_vm1, %v784_v0  ;;  %303 = vst.msk [vmem:[%s909_s21] sm:$0x1] %vm301_vm1, %v784_v0 }
  0x24 PF: > { %v304_v1 = vld [vmem:[%s275_s29] sm:$0xff]  ;;  %vm306_vm2 = vcmask 130048   ;;  %v785_v3 = vmov 0   ;;  %v320_v5 = vlaneseq  ;;  %s569_s18 = sshll.u32 %s888_s8, 3  ;;  %v786_v14 = vmov 0.0   ;;  %s422_s11 = sshll.u32 %s909_s21, 4  ;;  %s423_s11 = int_to_ptr.vmem [resolvable:$true] %s422_s11 }
  0x25   : > { %v307_v2 = vsel %vm306_vm2, %v304_v1, -inf  ;;  %653 = vset.pattern.permute.xlu0 %v785_v3  ;;  %v305_v4 = vld [vmem:[%s287_s26] sm:$0xff]  ;;  %v347_v9 = vstv %s569_s18  ;;  %vm374_vm5 = vcmask 122880   ;;  %s570_s26 = sshll.u32 %s770_s19, 4  ;;  %s394_s12 = scalar_lea.sflag [#allocation5], %s884_s6 }
  0x26   : > { %308 = vmax.xlane.f32.xlu0 %v307_v2  ;;  %v346_v7 = vshrl.u32 %v320_v5, 7  ;;  %v321_v12 = vand.u32 127, %v320_v5  ;;  %s420_s10 = scalar_lea.hbm %s1016_s4, %s570_s26  ;;  %s660_s14 = scalar_lea.vmem %s423_s11, 16 }
  0x27   : > { %p661_p1 = scmp.ne.s32.totalorder %s423_s11, %s660_s14  ;;  %s787_s23 = smov [#allocation4]  }
  0x28   : > { %v917_v11 = vadd.s32 %v347_v9, %v346_v7  ;;  %s664_s24 = sshll.u32 %s787_s23, 4  ;;  %s665_s24 = int_to_ptr.vmem [resolvable:$false] %s664_s24 }
  0x29   : > { %p662_p2 = pnand %p661_p1, %p863_p3  ;;  %s666_s29 = scalar_lea.vmem %s665_s24, 32 }
  0x2a   : > { %vm349_vm3 = vcmp.lt.s32.totalorder %v917_v11, 50  ;;  %v376_v25 = vld [vmem:[%s909_s21] sm:$0x1]  ;;  %p667_p5 = scmp.lt.s32.totalorder %s423_s11, %s665_s24  ;;  %p668_p6 = scmp.lt.s32.totalorder %s666_s29, %s660_s14 }
  0x2b   : > { %p663_p4 = pneg %p662_p2 }
  0x2c   : > { %p669_p7 = por %p668_p6, %p667_p5 }
  0x2e   : > { %p670_p8 = pnand %p669_p7, %p663_p4 }
  0x3c   : > { %323 = vperm.xlu0 %653, %v305_v4  }
  0xaf   : > { %v309_v6 = vpop.xlane.xlu0 %308 }
  0xb0   : > { %v310_v8 = vsub.f32 %v304_v1, %v309_v6 }
  0xb2   : > { %v311_v10 = vmul.f32 1.442695, %v310_v8  ;;  %v328_v27 = vsel %vm306_vm2, %v310_v8, 0.0 }
  0xb4   : > { %654 = vpow2.f32 %v311_v10 }
  0xb7   : > { %v324_v13 = vpop.permute.xlu0 %323 }
  0xb8   : > { %vm325_vm4 = vcmp.eq.s32.totalorder %v321_v12, %v324_v13 }
  0xb9   : > { %v567_v15 = vsel %vm325_vm4, 1.0, %v786_v14 }
  0xba   : > { %v354_v16 = vsel %vm349_vm3, %v567_v15, 0.0  ;;  %v333_v28 = vmul.f32 %v567_v15, %v310_v8 }
  0xbb   : > { %v377_v17 = vsel %vm306_vm2, %v354_v16, 0.0 }
  0xbc   : > { %v378_v18 = vrot.slane %v377_v17, 4  ;;  %v334_v30 = vsel %vm306_vm2, %v333_v28, 0.0 }
  0xbe   : > { %v379_v19 = vadd.f32 %v378_v18, %v377_v17 }
  0xc0   : > { %v380_v20 = vrot.slane %v379_v19, 2 }
  0xc1   : > { %v655_v21 = vpop.eup %654 }
  0xc2   : > { %v381_v22 = vadd.f32 %v380_v20, %v379_v19  ;;  %v313_v23 = vsel %vm306_vm2, %v655_v21, 0.0 }
  0xc3   : > { %314 = vadd.xlane.f32.xlu1 %v313_v23 }
  0xc4   : > { %v382_v24 = vrot.slane %v381_v22, 1 }
  0xc6   : > { %v383_v26 = vadd.f32 %v382_v24, %v381_v22 }
  0xc7   : > { %329 = vadd.xlane.f32.xlu1 %v328_v27 }
  0xc8   : > { %v384_v29 = vadd.f32 %v383_v26, %v376_v25 }
  0xca   : > { %385 = vst.msk [vmem:[%s909_s21] sm:$0x1] %vm374_vm5, %v384_v29 }
  0xcb   : > { %335 = vadd.xlane.f32.xlu1 %v334_v30 }
  0xcc   : > { %673 = shalt.err (!%p670_p8)
}
  0xcd   : > { %s674_s30 = scalar_lea.hbm %s420_s10, 16  ;;  %s678_s18 = scalar_lea.hbm %s1016_s4, 32 }
  0xce   : > { %p675_p10 = scmp.ne.s32.totalorder %s420_s10, %s674_s30  ;;  %p679_p13 = scmp.lt.s32.totalorder %s420_s10, %s1016_s4 }
  0xcf   : > { %p680_p0 = scmp.lt.s32.totalorder %s678_s18, %s674_s30 }
  0xd0   : > { %p676_p11 = pnand %p675_p10, %p863_p3 }
  0xd1   : > { %p681_p1 = por %p680_p0, %p679_p13 }
  0xd2   : > { %p677_p12 = pneg %p676_p11 }
  0xd4   : > { %p682_p2 = pnand %p681_p1, %p677_p12 }
  0xd6   : > { %685 = shalt.err (!%p682_p2)
}
  0xd7   : > { %575 = dma.vmem_to_hbm [thread:$0]  (%p863_p3), %s423_s11, 16, %s420_s10, %s394_s12   ;;  %v365_v53 = vld [vmem:[%s906_s25] sm:$0x1] }
  0xd8   : > { %s409_s10 = sshll.u32 %s906_s25, 4  ;;  %s961_s14 = scalar_lea.hbm %s1015_s3, %s570_s26  ;;  %s410_s10 = int_to_ptr.vmem [resolvable:$true] %s409_s10 }
  0xd9   : > { %s390_s23 = scalar_lea.sflag [#allocation3], %s884_s6  ;;  %s686_s24 = scalar_lea.vmem %s410_s10, 16 }
  0xda   : > { %p687_p4 = scmp.ne.s32.totalorder %s410_s10, %s686_s24  ;;  %s788_s29 = smov [#allocation2]  }
  0xdb   : > { %s690_s30 = sshll.u32 %s788_s29, 4  ;;  %s691_s30 = int_to_ptr.vmem [resolvable:$false] %s690_s30 }
  0xdc   : > { %p688_p5 = pnand %p687_p4, %p863_p3  ;;  %s692_s21 = scalar_lea.vmem %s691_s30, 32 }
  0xdd   : > { %p693_p7 = scmp.lt.s32.totalorder %s410_s10, %s691_s30  ;;  %p694_p8 = scmp.lt.s32.totalorder %s692_s21, %s686_s24 }
  0xde   : > { %p689_p6 = pneg %p688_p5 }
  0xdf   : > { %p695_p10 = por %p694_p8, %p693_p7 }
  0xe1   : > { %p696_p11 = pnand %p695_p10, %p689_p6 }
 0x14c   : > { %v315_v31 = vpop.xlane.xlu1 %314 }
 0x14d   : > { %656 = vrcp.f32 %v315_v31 }
 0x14e   : > { %658 = vlog2.f32 %v315_v31 }
 0x150   : > { %v330_v32 = vpop.xlane.xlu1 %329 }
 0x154   : > { %v336_v37 = vpop.xlane.xlu1 %335 }
 0x15a   : > { %v657_v33 = vpop.eup %656 }
 0x15b   : > { %v659_v34 = vpop.eup %658  ;;  %v317_v35 = vmul.f32 %v657_v33, %v655_v21 }
 0x15c   : > { %v319_v36 = vmul.f32 0.6931472, %v659_v34 }
 0x15d   : > { %v353_v38 = vsel %vm349_vm3, %v317_v35, 0.0 }
 0x15e   : > { %v331_v39 = vmul.f32 16.0, %v319_v36  ;;  %v337_v40 = vsub.f32 %v336_v37, %v319_v36  ;;  %v366_v41 = vsel %vm306_vm2, %v353_v38, 0.0 }
 0x15f   : > { %v367_v42 = vrot.slane %v366_v41, 4 }
 0x160   : > { %v332_v43 = vsub.f32 %v330_v32, %v331_v39  ;;  %v339_v46 = vmul.f32 0.8933333, %v337_v40 }
 0x161   : > { %v368_v44 = vadd.f32 %v367_v42, %v366_v41 }
 0x162   : > { %v338_v45 = vmul.f32 0.006666667, %v332_v43 }
 0x163   : > { %v369_v47 = vrot.slane %v368_v44, 2 }
 0x164   : > { %v340_v48 = vadd.f32 %v339_v46, %v338_v45 }
 0x165   : > { %v370_v49 = vadd.f32 %v369_v47, %v368_v44 }
 0x166   : > { %v341_v50 = vsub.f32 0.0, %v340_v48 }
 0x167   : > { %v371_v51 = vrot.slane %v370_v49, 1 }
 0x168   : > { %v350_v52 = vsel %vm349_vm3, %v341_v50, 0.0 }
 0x169   : > { %v356_v54 = vrot.slane %v350_v52, 4  ;;  %v372_v55 = vadd.f32 %v371_v51, %v370_v49 }
 0x16b   : > { %v357_v56 = vadd.f32 %v356_v54, %v350_v52  ;;  %v373_v57 = vadd.f32 %v372_v55, %v365_v53 }
 0x16d   : > { %v358_v58 = vrot.slane %v357_v56, 2  ;;  %375 = vst.msk [vmem:[%s906_s25] sm:$0x1] %vm374_vm5, %v373_v57 }
 0x16e   : > { %699 = shalt.err (!%p696_p11)
}
 0x16f   : > { %s700_s19 = scalar_lea.hbm %s961_s14, 16  ;;  %s704_s26 = scalar_lea.hbm %s1015_s3, 32 }
 0x170   : > { %p701_p12 = scmp.ne.s32.totalorder %s961_s14, %s700_s19  ;;  %p705_p1 = scmp.lt.s32.totalorder %s961_s14, %s1015_s3 }
 0x171   : > { %p706_p2 = scmp.lt.s32.totalorder %s704_s26, %s700_s19 }
 0x172   : > { %p702_p13 = pnand %p701_p12, %p863_p3 }
 0x173   : > { %p707_p4 = por %p706_p2, %p705_p1 }
 0x174   : > { %p703_p0 = pneg %p702_p13 }
 0x176   : > { %p708_p5 = pnand %p707_p4, %p703_p0 }
 0x178   : > { %711 = shalt.err (!%p708_p5)
}
 0x179   : > { %574 = dma.vmem_to_hbm [thread:$0]  (%p863_p3), %s410_s10, 16, %s961_s14, %s390_s23   ;;  %v359_v59 = vadd.f32 %v358_v58, %v357_v56  ;;  %v355_v61 = vld [vmem:[%s897_s13] sm:$0x1]  ;;  %vm363_vm6 = vcmask 0  }
 0x17b   : > { %v360_v60 = vrot.slane %v359_v59, 1 }
 0x17d   : > { %v361_v62 = vadd.f32 %v360_v60, %v359_v59 }
 0x17f   : > { %v362_v63 = vadd.f32 %v361_v62, %v355_v61 }
 0x181   : > { %364 = vst.msk [vmem:[%s897_s13] sm:$0x1] %vm363_vm6, %v362_v63 }
 0x182 PF: > { %p585_p6 = scmp.ge.s32.totalorder %s782_s22, 2  ;;  %s440_s8 = sand.u32 1, %s754_s15  }
 0x183   : > { %s441_s27 = scalar_lea.sflag [#allocation3], %s440_s8 }
 0x184   : > { %p579_p7 = pnand %p585_p6, %p873_p9 }
 0x186   : > { %p580_p8 = pneg %p579_p7 }
 0x188   : > { %745 = dma.done.wait (%p580_p8), %s441_s27, 16  }
 0x189   : > { %747 = vsyncadd (%p580_p8), %s441_s27, 4294967280  ;;  %s449_s9 = scalar_lea.sflag [#allocation5], %s440_s8 }
 0x18a   : > { %749 = dma.done.wait (%p580_p8), %s449_s9, 16  }
 0x18b   : > { %751 = vsyncadd (%p580_p8), %s449_s9, 4294967280  ;;  %s21_s22 = sadd.s32 1, %s782_s22   ;;  %s1024_s19 = sld [smem:[#allocation8_spill]] }
 0x18c   : > { %p18_p3 = scmp.ge.s32.totalorder %s21_s22, 10   ;;  %s1025_s13 = sld [smem:[#allocation9_spill]] }
 0x18d   : > { %s1026_s21 = sld [smem:[#allocation10_spill]]  ;;  %s1027_s15 = smov %s758_s16 }
 0x18e   : > { %s1028_s16 = smov %s762_s17  ;;  %s1029_s17 = smov %s881_s5 }
 0x18f   : > { %s1030_s18 = smov %s774_s20  ;;  %20 = sbr.rel (!%p18_p3) target bundleno = 7 (0x7), region = 99 }
 0x192   : > { %s1031_s20 = smov %s1025_s13 }
 0x194   :  { %453 = vsyncpa [#allocation3], 1 }
 0x195   :  { %455 = vsyncpa [#allocation3 + $0x1], 1 }
 0x196   :  { %456 = vsyncpa [#allocation5], 1 }
 0x197   :  { %458 = vsyncpa [#allocation5 + $0x1], 1 }

</bundles_post_ra>
